<compile_context>
chip_gen: v7x
topology: tpu7x:2x2x1
jax: 0.10.0
libtpu: 0.0.40
codegen_flags: <defaults>
</compile_context>

<pallas_src>
import functools

import jax
import jax.numpy as jnp
from jax.experimental import pallas as pl
from jax.experimental.pallas import tpu as pltpu


def _spectral_attn_kernel(x_ref, wf_ref, bp_ref, o_ref, *, pad_dim):
    """One batch tile: in-kernel transpose + fused qkv/proj matmul + channel attention."""
    P = pad_dim

    # x tile arrives untransposed as (N, C); transpose on the XLU here instead
    # of a separate HBM->HBM transpose pass in the wrapper.
    xt = jnp.transpose(x_ref[0])                       # (C, N) f32
    xt_bf = xt.astype(jnp.bfloat16)                    # bf16 MXU operand

    # One MXU pass: [q*scale | k | v @ Wp^T], each section lane-padded to P.
    qkv = jnp.dot(xt_bf, wf_ref[...],
                  preferred_element_type=jnp.float32)  # (C, 3P) f32 accum
    q = qkv[:, 0 * P:1 * P]       # scale already folded into the weight
    k = qkv[:, 1 * P:2 * P]
    vp = qkv[:, 2 * P:3 * P]      # v already projected by proj.weight.T

    # Channel attention: (C, P) x (C, P)^T -> (C, C); padded lanes are zero in
    # both q and k so they contribute nothing to the contraction.
    attn = jax.lax.dot_general(
        q.astype(jnp.bfloat16), k.astype(jnp.bfloat16),
        (((1,), (1,)), ((), ())), preferred_element_type=jnp.float32)

    # Softmax kept fully in f32 (v5e has no bf16 VPU/EUP); exact divide — the
    # MXU passes dominate, the divide is not the bottleneck.
    attn = attn - jnp.max(attn, axis=-1, keepdims=True)
    p = jnp.exp(attn)
    p = p / jnp.sum(p, axis=-1, keepdims=True)

    # y = p @ v' + bias  (lane-dense (C, P); padded lanes stay 0 + 0).
    y = jnp.dot(p.astype(jnp.bfloat16), vp.astype(jnp.bfloat16),
                preferred_element_type=jnp.float32) + bp_ref[...]
    o_ref[0] = y.astype(o_ref.dtype)


def prepare_spectral_attention_params(w_qkv, w_proj, b_proj, num_heads):
    """Fold q-scale and output projection into one lane-padded bf16 weight.

    Run once per parameter set (at load / under jit) and reuse across forwards.
    Returns (w_fused[bf16, (dim, 3P)], bp[f32, (1, P)], dim).
    """
    dim = w_proj.shape[0]
    head_dim = dim // num_heads
    assert head_dim * num_heads == dim
    assert head_dim == dim, (
        "Source module's proj = Linear(dim, dim) is applied to head_dim "
        "features; the PyTorch forward only typechecks when num_heads == 1.")
    scale = float(head_dim) ** -0.5
    P = ((dim + 127) // 128) * 128

    # Folds done in f32; only the final fused weight is cast to bf16
    # (avoids compounding rounding, per the review's correctness note).
    w_qkv_t = w_qkv.T.astype(jnp.float32)                 # (dim, 3*dim)
    wq = w_qkv_t[:, 0 * dim:1 * dim] * scale               # fold q scale
    wk = w_qkv_t[:, 1 * dim:2 * dim]
    wv = w_qkv_t[:, 2 * dim:3 * dim]
    wvp = wv @ w_proj.T.astype(jnp.float32)                # fold output projection

    def lane_pad(w):                                       # (dim, dim) -> (dim, P)
        return jnp.pad(w, ((0, 0), (0, P - dim)))

    w_fused = jnp.concatenate([lane_pad(wq), lane_pad(wk), lane_pad(wvp)],
                              axis=1).astype(jnp.bfloat16)  # (dim, 3P) bf16
    # Bias stays f32: it is added after the f32 accumulation and is only P*4 B.
    bp = jnp.pad(b_proj.astype(jnp.float32), (0, P - dim)).reshape(1, P)
    return w_fused, bp, dim


def _vmem_limit_bytes(N, C, dim, P):
    bf16, f32 = 2, 4
    x_tile = N * C * f32 * 2               # double-buffered activation tile
    weights = dim * 3 * P * bf16           # single-buffered (Buffered(1))
    bias = P * f32
    out_tile = C * P * f32 * 2             # double-buffered output tile
    scratch = (C * 3 * P + C * C + C * P) * f32   # qkv / attn / y intermediates
    est = x_tile + weights + bias + out_tile + scratch
    return int(min(max(4 * est, 8 << 20), 64 << 20))   # headroom; v7x-safe cap


def spectral_attention_fused(x, w_fused, bp, dim):
    """Hot path: pallas_call + cheap reshape glue.  x: (B, N, C), N == dim."""
    B, N, C = x.shape
    assert N == dim, "qkv Linear acts on the transposed axis => requires N == dim"
    P = w_fused.shape[1] // 3

    kernel = functools.partial(_spectral_attn_kernel, pad_dim=P)

    y = pl.pallas_call(
        kernel,
        out_shape=jax.ShapeDtypeStruct((B, C, P), x.dtype),
        grid_spec=pl.GridSpec(
            grid=(B,),
            in_specs=[
                pl.BlockSpec((1, N, C), lambda b: (b, 0, 0)),        # x (untransposed)
                pl.BlockSpec((dim, 3 * P), lambda b: (0, 0),
                             pipeline_mode=pl.Buffered(1)),          # fused weight
                pl.BlockSpec((1, P), lambda b: (0, 0),
                             pipeline_mode=pl.Buffered(1)),          # padded bias
            ],
            out_specs=pl.BlockSpec((1, C, P), lambda b: (b, 0, 0)),
        ),
        compiler_params=pltpu.CompilerParams(
            dimension_semantics=("parallel",),
            vmem_limit_bytes=_vmem_limit_bytes(N, C, dim, P)),
    )(x, w_fused, bp)

    # Drop lane padding only when it exists; the module's transpose(1,2) is a
    # no-op on the squeezed head axis, so the final step is the raw reshape.
    if P != dim:
        y = y[:, :, :dim]
    return y.reshape(B, N, C)


def spectral_attention(x, w_qkv, w_proj, b_proj, num_heads):
    """Convenience wrapper (prep not cached — prefer prepare_* + *_fused)."""
    w_fused, bp, dim = prepare_spectral_attention_params(w_qkv, w_proj, b_proj,
                                                         num_heads)
    return spectral_attention_fused(x, w_fused, bp, dim)


def spectral_attention_ref(x, w_qkv, w_proj, b_proj, num_heads):
    """Pure-JAX f32 reference mirroring the PyTorch forward line by line."""
    B, N, C = x.shape
    dim = N
    head_dim = dim // num_heads
    scale = float(head_dim) ** -0.5
    xt = jnp.swapaxes(x, -1, -2)                                   # (B, C, N)
    qkv = xt @ w_qkv.T                                             # (B, C, 3*dim)
    qkv = qkv.reshape(B, C, 3, num_heads, head_dim).transpose(2, 0, 3, 1, 4)
    q, k, v = qkv[0], qkv[1], qkv[2]
    q = q * scale
    attn = q @ jnp.swapaxes(k, -2, -1)
    attn = jax.nn.softmax(attn, axis=-1)
    out = attn @ v
    out = out @ w_proj.T + b_proj
    return jnp.swapaxes(out, 1, 2).reshape(B, N, C)


def spectral_attention_ref_mixed(x, w_fused, bp, dim):
    """Plain-JAX model of the exact kernel arithmetic (bf16 MXU ops, f32 accum)."""
    B, N, C = x.shape
    P = w_fused.shape[1] // 3
    xt = jnp.swapaxes(x, -1, -2).astype(jnp.bfloat16)              # (B, C, N)
    qkv = jnp.einsum('bcn,np->bcp', xt, w_fused,
                     preferred_element_type=jnp.float32)
    q, k, vp = qkv[..., :P], qkv[..., P:2 * P], qkv[..., 2 * P:]
    attn = jnp.einsum('bcp,bdp->bcd', q.astype(jnp.bfloat16),
                      k.astype(jnp.bfloat16),
                      preferred_element_type=jnp.float32)
    attn = attn - jnp.max(attn, axis=-1, keepdims=True)
    p = jnp.exp(attn)
    p = p / jnp.sum(p, axis=-1, keepdims=True)
    y = jnp.einsum('bcd,bdp->bcp', p.astype(jnp.bfloat16),
                   vp.astype(jnp.bfloat16),
                   preferred_element_type=jnp.float32) + bp
    return y[..., :dim].reshape(B, N, C)


if __name__ == "__main__":
    key = jax.random.PRNGKey(0)
    B, C = 2, 16
    dim = 32          # sequence length N must equal dim for this module
    N = dim
    num_heads = 1     # the only head count for which the PyTorch forward runs
    kx, kq, kp, kb = jax.random.split(key, 4)

    x = jax.random.normal(kx, (B, N, C), dtype=jnp.float32)
    w_qkv = jax.random.normal(kq, (3 * dim, dim), dtype=jnp.float32) * (dim ** -0.5)
    w_proj = jax.random.normal(kp, (dim, dim), dtype=jnp.float32) * (dim ** -0.5)
    b_proj = jax.random.normal(kb, (dim,), dtype=jnp.float32) * 0.1

    # Weight prep hoisted out of the hot path: prepare once, reuse per forward.
    w_fused, bp, dim_ = prepare_spectral_attention_params(w_qkv, w_proj, b_proj,
                                                          num_heads)

    y = spectral_attention_fused(x, w_fused, bp, dim_)
    y = jax.block_until_ready(y)

    # Tight check vs. a plain-JAX model of the kernel's exact arithmetic.
    y_mix = spectral_attention_ref_mixed(x, w_fused, bp, dim_)
    err_mix = float(jnp.max(jnp.abs(y - y_mix)))
    assert jnp.allclose(y, y_mix, atol=1e-3, rtol=1e-3), \
        f"kernel vs mixed-precision ref: max abs err {err_mix}"

    # Semantic check vs. the f32 PyTorch-faithful reference; tolerance is at
    # bf16-operand level since the kernel intentionally uses bf16 MXU inputs.
    y_ref = spectral_attention_ref(x, w_qkv, w_proj, b_proj, num_heads)
    err_f32 = float(jnp.max(jnp.abs(y - y_ref)))
    assert jnp.allclose(y, y_ref, atol=1e-1, rtol=1e-1), \
        f"kernel vs f32 ref: max abs err {err_f32}"

    print("KERNEL_OK")
</pallas_src>

<mosaic_0001>
module attributes {stable_mosaic.version = 11 : i64} {
  func.func @_spectral_attn_kernel(%arg0: i32, %arg1: memref<1x32x16xf32, #tpu.memory_space<vmem>>, %arg2: memref<32x384xbf16, #tpu.memory_space<vmem>>, %arg3: memref<1x128xf32, #tpu.memory_space<vmem>>, %arg4: memref<1x16x128xf32, #tpu.memory_space<vmem>>) attributes {dimension_semantics = [#tpu.dimension_semantics<parallel>], iteration_bounds = array<i64: 2>, scalar_prefetch = 0 : i64, scratch_operands = 0 : i64, tpu.core_type = #tpu.core_type<tc>, window_params = [{transform_indices = @transform_0, window_bounds = array<i64: 1, 32, 16>}, {pipeline_mode = #tpu.pipeline_mode<synchronous>, transform_indices = @transform_1, window_bounds = array<i64: 32, 384>}, {pipeline_mode = #tpu.pipeline_mode<synchronous>, transform_indices = @transform_2, window_bounds = array<i64: 1, 128>}, {transform_indices = @transform_3, window_bounds = array<i64: 1, 16, 128>}]} {
    %c0 = arith.constant 0 : index
    %c0_0 = arith.constant 0 : index
    %c0_1 = arith.constant 0 : index
    %0 = vector.load %arg1[%c0, %c0_0, %c0_1] : memref<1x32x16xf32, #tpu.memory_space<vmem>>, vector<1x32x16xf32>
    %1 = vector.shape_cast %0 : vector<1x32x16xf32> to vector<32x16xf32>
    %2 = tpu.transpose %1, [1, 0] : vector<32x16xf32> -> vector<16x32xf32>
    %3 = arith.truncf %2 : vector<16x32xf32> to vector<16x32xbf16>
    %c0_2 = arith.constant 0 : index
    %c0_3 = arith.constant 0 : index
    %4 = vector.load %arg2[%c0_2, %c0_3] : memref<32x384xbf16, #tpu.memory_space<vmem>>, vector<32x384xbf16>
    %cst = arith.constant dense<0.000000e+00> : vector<16x384xf32>
    %5 = tpu.matmul %3, %4, %cst {dimension_numbers = #tpu.dot_dimension_numbers<[1], [0], [0], [1], [0, 0, 1, 1], [], []>} : vector<16x32xbf16>, vector<32x384xbf16>, vector<16x384xf32> -> vector<16x384xf32>
    %6 = vector.extract_strided_slice %5 {offsets = [0, 0], sizes = [16, 128], strides = [1, 1]} : vector<16x384xf32> to vector<16x128xf32>
    %7 = vector.extract_strided_slice %5 {offsets = [0, 128], sizes = [16, 128], strides = [1, 1]} : vector<16x384xf32> to vector<16x128xf32>
    %8 = vector.extract_strided_slice %5 {offsets = [0, 256], sizes = [16, 128], strides = [1, 1]} : vector<16x384xf32> to vector<16x128xf32>
    %9 = arith.truncf %6 : vector<16x128xf32> to vector<16x128xbf16>
    %10 = arith.truncf %7 : vector<16x128xf32> to vector<16x128xbf16>
    %cst_4 = arith.constant dense<0.000000e+00> : vector<16x16xf32>
    %11 = tpu.matmul %9, %10, %cst_4 {dimension_numbers = #tpu.dot_dimension_numbers<[1], [1], [0], [0], [0, 0, 1, 0], [], []>} : vector<16x128xbf16>, vector<16x128xbf16>, vector<16x16xf32> -> vector<16x16xf32>
    %cst_5 = arith.constant dense<0xFF800000> : vector<16xf32>
    %12 = vector.multi_reduction <maximumf>, %11, %cst_5 [1] : vector<16x16xf32> to vector<16xf32>
    %13 = vector.shape_cast %12 : vector<16xf32> to vector<16x1xf32>
    %14 = vector.broadcast %13 : vector<16x1xf32> to vector<16x16xf32>
    %15 = arith.subf %11, %14 : vector<16x16xf32>
    %16 = math.exp %15 : vector<16x16xf32>
    %cst_6 = arith.constant dense<0.000000e+00> : vector<16xf32>
    %17 = vector.multi_reduction <add>, %16, %cst_6 [1] : vector<16x16xf32> to vector<16xf32>
    %18 = vector.shape_cast %17 : vector<16xf32> to vector<16x1xf32>
    %19 = vector.broadcast %18 : vector<16x1xf32> to vector<16x16xf32>
    %20 = arith.divf %16, %19 : vector<16x16xf32>
    %21 = arith.truncf %20 : vector<16x16xf32> to vector<16x16xbf16>
    %22 = arith.truncf %8 : vector<16x128xf32> to vector<16x128xbf16>
    %cst_7 = arith.constant dense<0.000000e+00> : vector<16x128xf32>
    %23 = tpu.matmul %21, %22, %cst_7 {dimension_numbers = #tpu.dot_dimension_numbers<[1], [0], [0], [1], [0, 0, 1, 1], [], []>} : vector<16x16xbf16>, vector<16x128xbf16>, vector<16x128xf32> -> vector<16x128xf32>
    %c0_8 = arith.constant 0 : index
    %c0_9 = arith.constant 0 : index
    %24 = vector.load %arg3[%c0_8, %c0_9] : memref<1x128xf32, #tpu.memory_space<vmem>>, vector<1x128xf32>
    %25 = vector.broadcast %24 : vector<1x128xf32> to vector<16x128xf32>
    %26 = arith.addf %23, %25 : vector<16x128xf32>
    %c0_10 = arith.constant 0 : index
    %c0_11 = arith.constant 0 : index
    %c0_12 = arith.constant 0 : index
    %27 = vector.load %arg4[%c0_10, %c0_11, %c0_12] : memref<1x16x128xf32, #tpu.memory_space<vmem>>, vector<1x16x128xf32>
    %28 = vector.shape_cast %27 : vector<1x16x128xf32> to vector<16x128xf32>
    %29 = vector.shape_cast %26 : vector<16x128xf32> to vector<1x16x128xf32>
    tpu.vector_store %arg4[%c0_10, %c0_11, %c0_12], %29 {strides = array<i32>} : memref<1x16x128xf32, #tpu.memory_space<vmem>>, vector<1x16x128xf32>,
    return
  }
  func.func @transform_0(%arg0: i32) -> (i32, i32, i32) {
    %c0_i32 = arith.constant 0 : i32
    %c0_i32_0 = arith.constant 0 : i32
    %c0_i32_1 = arith.constant 0 : i32
    return %arg0, %c0_i32, %c0_i32_0 : i32, i32, i32
  }
  func.func @transform_1(%arg0: i32) -> (i32, i32) {
    %c0_i32 = arith.constant 0 : i32
    %c0_i32_0 = arith.constant 0 : i32
    %c0_i32_1 = arith.constant 0 : i32
    return %c0_i32, %c0_i32_0 : i32, i32
  }
  func.func @transform_2(%arg0: i32) -> (i32, i32) {
    %c0_i32 = arith.constant 0 : i32
    %c0_i32_0 = arith.constant 0 : i32
    %c0_i32_1 = arith.constant 0 : i32
    return %c0_i32, %c0_i32_0 : i32, i32
  }
  func.func @transform_3(%arg0: i32) -> (i32, i32, i32) {
    %c0_i32 = arith.constant 0 : i32
    %c0_i32_0 = arith.constant 0 : i32
    %c0_i32_1 = arith.constant 0 : i32
    return %arg0, %c0_i32, %c0_i32_0 : i32, i32, i32
  }
}

</mosaic_0001>

<bundles_post_ra>
// kernel: tpu_custom_call.1
= control target key start
LH: loop header
LB: loop body
LE: loop exit
PB: predicated region body
PF: predicated region fallthrough
CT: control target
= control target key end

     0   :  { %8 = vsyncpa [#allocation3], 0  ;;  %s862_s0 = inlined_call_operand.vmem [shape: f32[2,32,16], index: 0, kind: input, shape index: {}]   ;;  %s863_s1 = inlined_call_operand.vmem [shape: bf16[32,384], index: 1, kind: input, shape index: {}]   ;;  %s864_s2 = inlined_call_operand.vmem [shape: f32[1,128], index: 2, kind: input, shape index: {}]   ;;  %s865_s3 = inlined_call_operand.hbm [shape: f32[2,16,128], index: 3, kind: output, shape index: {}]  }
   0x1   :  { %10 = vsyncpa [#allocation3 + $0x1], 0  ;;  %s733_s12 = smov 0   ;;  %s735_s13 = smov 0  }
   0x2   :  { %s737_s14 = smov 0   ;;  %s739_s15 = smov 0  }
   0x3 LB: > { %s754_s16 = sadd.s32 4294967295, %s705_s15   ;;  %s532_s17 = sadd.s32 4294967294, %s705_s15   ;;  %s705_s15 = sphi %s739_s15, %s871_s15   ;;  %s701_s14 = sphi %s737_s14, %s870_s14   ;;  %s697_s13 = sphi %s735_s13, %s869_s13   ;;  %s693_s12 = sphi %s733_s12, %s868_s12  }
   0x4   : > { %s758_s18 = sadd.s32 1, %s705_s15   ;;  %s91_s19 = sadd.s32 1, %s701_s14 }
   0x5   : > { %s88_s20 = ssub.s32 %s705_s15, %s758_s18  ;;  %p101_p0 = scmp.ne.s32.totalorder %s701_s14, %s697_s13 }
   0x6   : > { %p89_p1 = scmp.eq.s32.totalorder %s88_s20, 0  ;;  %p102_p2 = scmp.eq.s32.totalorder %s754_s16, 1 }
   0x7   : > { %p107_p3 = scmp.ne.s32.totalorder %s697_s13, %s693_s12  ;;  %p108_p4 = scmp.eq.s32.totalorder %s532_s17, 1 }
   0x8   : > { %s769_s21 = scalar_select %p89_p1, %s701_s14, %s91_s19  }
   0x9   : > { %p771_p5 = por %p102_p2, %p101_p0  ;;  %p775_p6 = por %p108_p4, %p107_p3 }
   0xa   : > { %p535_p7 = scmp.ge.s32.totalorder %s705_s15, 1  ;;  %p140_p8 = scmp.lt.s32.totalorder %s705_s15, 3 }
   0xc   : > { %p141_p9 = pnand %p535_p7, %p140_p8 }
   0xd   : > { %p164_p10 = scmp.lt.s32.totalorder (!%p141_p9), %s754_s16, 1  ;;  %v627_v0 = vld [vmem:[%s863_s1 + $0x4] ss:$12 sps:$4 sm:$0xff] (!%p141_p9)   ;;  %v707_v1 = vmov (!%p141_p9), 0.0   ;;  %v629_v2 = vld [vmem:[%s863_s1] ss:$12 sps:$4 sm:$0xff] (!%p141_p9)  }
   0xe   : > { %144 = sbr.rel (%p141_p9) target bundleno = 1148 (0x47c), region = 32  ;;  %563 = vmatprep.subr.bf16.mxu1 (!%p141_p9), %v707_v1  ;;  %251 = vmatprep.subr.bf16.mxu0 (!%p141_p9), %v627_v0  ;;  %v630_v3 = vld [vmem:[%s863_s1 + $0x8] ss:$12 sps:$4 sm:$0xff] (!%p141_p9)   ;;  %v633_v6 = vld [vmem:[%s863_s1 + $0x18] ss:$12 sps:$4 sm:$0xff] (!%p141_p9)   ;;  %v708_v10 = vmov (!%p141_p9), 0  }
   0xf   : > { %252 = vmatpush1.bf16.msra.mxu0 (!%p141_p9), %v629_v2  ;;  %564 = vmatpush3.bf16.msra.mxu1 (!%p141_p9), %v630_v3  ;;  %v631_v5 = vld [vmem:[%s863_s1 + $0x1c] ss:$12 sps:$4 sm:$0xff] (!%p141_p9)   ;;  %v634_v8 = vld [vmem:[%s863_s1 + $0x20] ss:$12 sps:$4 sm:$0xff] (!%p141_p9)   ;;  %vm709_vm0 = vmmov (!%p141_p9), 0   ;;  %vm247_vm1 = vcmask (!%p141_p9), 261120  }
  0x10   : > { %565 = vmatprep.subr.bf16.mxu1 (!%p141_p9), %v707_v1  ;;  %253 = vmatprep.subr.bf16.mxu0 (!%p141_p9), %v631_v5  ;;  %vm378_vm2 = vcmask (!%p141_p9), 130048   ;;  %s161_s20 = sand.u32 (!%p141_p9), 1, %s697_s13   ;;  %v547_v49 = vld [vmem:[%s864_s2] ss:$0 sm:$0xff] (!%p141_p9)  ;;  %s555_s29 = sshll.u32 (!%p141_p9), %s754_s16, 8 }
  0x11   : > { %283 = vmatprep.mubr.bf16.mxu0 (!%p141_p9), %v708_v10  ;;  %567 = vmatprep.mubr.msk.bf16.mxu1 (!%p141_p9), %vm709_vm0, %v707_v1  ;;  %s536_s24 = sshll.u32 (!%p141_p9), %s161_s20, 4  ;;  %s819_s5 = scalar_lea.hbm (!%p141_p9), %s865_s3, %s555_s29 }
  0x12   : > { %s163_s27 = scalar_lea.vmem (!%p141_p9), [#allocation2], %s536_s24  ;;  %s821_s6 = scalar_lea.sflag (!%p141_p9), [#allocation3], %s161_s20 }
  0x13   : > { %254 = vmatpush1.bf16.msra.mxu0 (!%p141_p9), %v633_v6  ;;  %566 = vmatpush3.bf16.msra.mxu1 (!%p141_p9), %v634_v8 }
  0x14   : > { %577 = vmatprep.subr.bf16.mxu1 (!%p141_p9), %v707_v1  ;;  %571 = vmatprep.subr.bf16.mxu0 (!%p141_p9), %v707_v1 }
  0x15   : > { %s165_s28 = scalar_select %p164_p10, %s754_s16, 1 }
  0x17   : > { %s554_s4 = sshll.u32 %s165_s28, 5  ;;  %s470_s28 = sshll.u32 %s163_s27, 4  ;;  %s814_s28 = int_to_ptr.vmem [resolvable:$true] %s470_s28 }
  0x18   : > { %s168_s7 = scalar_lea.vmem %s862_s0, %s554_s4  ;;  %s643_s16 = scalar_lea.vmem %s814_s28, 256 }
  0x19   : > { %v170_v4 = vld [vmem:[%s168_s7] sm:$0xff]  ;;  %v171_v7 = vld [vmem:[%s168_s7 + $0x8] sm:$0xff]  ;;  %v172_v9 = vld [vmem:[%s168_s7 + $0x10] sm:$0xff]  ;;  %p644_p11 = scmp.ne.s32.totalorder %s814_s28, %s643_s16 }
  0x1a   : > { %174 = vxpose.xlu0.b32.start [1/4] (short) (narrow) %v170_v4, 16  ;;  %v173_v11 = vld [vmem:[%s168_s7 + $0x18] sm:$0xff]  ;;  %s710_s7 = smov [#allocation2]  }
  0x1b   : > { %p645_p12 = pnand %p644_p11, %p771_p5  ;;  %s647_s8 = sshll.u32 %s710_s7, 4  ;;  %s648_s8 = int_to_ptr.vmem [resolvable:$false] %s647_s8 }
  0x1c   : > { %s649_s9 = scalar_lea.vmem %s648_s8, 512  ;;  %p650_p0 = scmp.lt.s32.totalorder %s814_s28, %s648_s8 }
  0x1d   : > { %p646_p13 = pneg %p645_p12  ;;  %p651_p1 = scmp.lt.s32.totalorder %s649_s9, %s643_s16 }
  0x1e   : > { %175 = vxpose.xlu0.b32.cont [2/4] (short) (narrow) %v171_v7, 16 }
  0x1f   : > { %p652_p2 = por %p651_p1, %p650_p0 }
  0x21   : > { %p653_p3 = pnand %p652_p2, %p646_p13 }
  0x22   : > { %176 = vxpose.xlu0.b32.cont [3/4] (short) (narrow) %v172_v9, 16 }
  0x26   : > { %177 = vxpose.xlu0.b32.end [4/4] (short) (narrow) %v173_v11, 16 }
  0x9a   : > { %v190_v12 = vpop.trf.xlu0 }
  0x9e   : > { %v191_v13 = vpop.trf.xlu0 }
  0x9f   : > { %v206_v14 = vpack.c.bf16 %v191_v13, %v190_v12 }
  0xa1   : > { %545 = vmatmul.mubr.msk.bf16.vlgmr.msra.gmra.mrb[0].mxu0 %vm247_vm1, %v206_v14  ;;  %568 = vmatmul.mubr.msk.bf16.vlgmr.msra.gmra.mrb[0].mxu1 %vm247_vm1, %v206_v14 }
  0xa2   : > { %573 = vmatprep.mubr.msk.bf16.mxu0 %vm709_vm0, %v707_v1  ;;  %579 = vmatprep.mubr.msk.bf16.mxu1 %vm709_vm0, %v707_v1 }
 0x174   : > { %v285_v15 = vpop.f32.mrb[0].mxu0  ;;  %v328_v16 = vpop.f32.mrb[0].mxu1 }
 0x175   : > { %v287_v17 = vpop.f32.mrb[1].mxu0  ;;  %v569_v18 = vpop.f32.mrb[1].mxu1 }
 0x176   : > { %v289_v19 = vpop.f32.mrb[2].mxu0  ;;  %v331_v20 = vpop.f32.mrb[2].mxu1 }
 0x177   : > { %v335_v21 = vpack.c.bf16 %v289_v19, %v285_v15  ;;  %v402_v22 = vpack.c.bf16 %v331_v20, %v328_v16  ;;  %v291_v23 = vpop.f32.mrb[3].mxu0  ;;  %v570_v24 = vpop.f32.mrb[3].mxu1 }
 0x178   : > { %v336_v25 = vpack.c.bf16 %v291_v23, %v287_v17 }
 0x179   : > { %578 = vmatpush3.bf16.msra.mxu1 %v402_v22 }
 0x17a   : > { %572 = vmatpush3.bf16.xpose.msra.mxu0 %v336_v25 }
 0x181   : > { %574 = vmatmul.mubr.bf16.vlgmr.msra.gmra.mrb[4].mxu0 %v335_v21 }
 0x254   : > { %v371_v26 = vpop.f32.mrb[4].mxu0 }
 0x255   : > { %v575_v27 = vpop.f32.mrb[5].mxu0  ;;  %v379_v28 = vsel %vm378_vm2, %v371_v26, -inf }
 0x256   : > { %380 = vmax.xlane.f32.xlu1 %v379_v28  ;;  %v374_v29 = vpop.f32.mrb[6].mxu0 }
 0x257   : > { %v576_v30 = vpop.f32.mrb[7].mxu0  ;;  %v382_v31 = vsel %vm378_vm2, %v374_v29, -inf }
 0x25a   : > { %383 = vmax.xlane.f32.xlu1 %v382_v31 }
 0x2e3   : > { %v381_v32 = vpop.xlane.xlu1 %380 }
 0x2e4   : > { %v385_v33 = vsub.f32 %v371_v26, %v381_v32 }
 0x2e6   : > { %v387_v34 = vmul.f32 1.442695, %v385_v33 }
 0x2e7   : > { %v384_v35 = vpop.xlane.xlu1 %383 }
 0x2e8   : > { %635 = vpow2.f32 %v387_v34  ;;  %v386_v36 = vsub.f32 %v374_v29, %v384_v35 }
 0x2ea   : > { %v389_v37 = vmul.f32 1.442695, %v386_v36 }
 0x2ec   : > { %637 = vpow2.f32 %v389_v37 }
 0x2f2   : > { %v636_v38 = vpop.eup %635 }
 0x2f3   : > { %v391_v39 = vsel %vm378_vm2, %v636_v38, 0.0 }
 0x2f4   : > { %392 = vadd.xlane.f32.xlu1 %v391_v39 }
 0x2f6   : > { %v638_v40 = vpop.eup %637 }
 0x2f7   : > { %v394_v41 = vsel %vm378_vm2, %v638_v40, 0.0 }
 0x2f8   : > { %395 = vadd.xlane.f32.xlu1 %v394_v41 }
 0x381   : > { %v393_v42 = vpop.xlane.xlu1 %392 }
 0x382   : > { %639 = vrcp.f32 %v393_v42 }
 0x385   : > { %v396_v43 = vpop.xlane.xlu1 %395 }
 0x386   : > { %641 = vrcp.f32 %v396_v43 }
 0x38c   : > { %v640_v44 = vpop.eup %639 }
 0x38d   : > { %v398_v46 = vmul.f32 %v640_v44, %v636_v38 }
 0x390   : > { %v642_v45 = vpop.eup %641 }
 0x391   : > { %v400_v47 = vmul.f32 %v642_v45, %v638_v40 }
 0x393   : > { %v401_v48 = vpack.c.bf16 %v400_v47, %v398_v46 }
 0x395   : > { %580 = vmatmul.mubr.msk.bf16.vlgmr.msra.gmra.mrb[4].mxu1 %vm378_vm2, %v401_v48 }
 0x468   : > { %v447_v50 = vpop.f32.mrb[4].mxu1 }
 0x469   : > { %v448_v51 = vadd.f32 %v547_v49, %v447_v50  ;;  %v581_v52 = vpop.f32.mrb[5].mxu1 }
 0x46a   : > { %v450_v53 = vpop.f32.mrb[6].mxu1 }
 0x46b   : > { %454 = vst [vmem:[%s163_s27] sm:$0xff] %v448_v51  ;;  %v451_v54 = vadd.f32 %v547_v49, %v450_v53  ;;  %v582_v55 = vpop.f32.mrb[7].mxu1 }
 0x46d   : > { %455 = vst [vmem:[%s163_s27 + $0x8] sm:$0xff] %v451_v54 }
 0x46e   : > { %656 = shalt.err (!%p653_p3)
}
 0x46f   : > { %s657_s10 = scalar_lea.hbm %s819_s5, 256  ;;  %s661_s19 = scalar_lea.hbm %s865_s3, 512 }
 0x470   : > { %p658_p4 = scmp.ne.s32.totalorder %s819_s5, %s657_s10  ;;  %p662_p9 = scmp.lt.u32.totalorder %s819_s5, %s865_s3 }
 0x471   : > { %p663_p10 = scmp.lt.u32.totalorder %s661_s19, %s657_s10  ;;  %p665_p12 = scmp.lt.u32.totalorder %s657_s10, %s819_s5 }
 0x472   : > { %p659_p7 = pnand %p658_p4, %p771_p5 }
 0x473   : > { %p664_p11 = por %p663_p10, %p662_p9 }
 0x474   : > { %p660_p8 = pneg %p659_p7 }
 0x475   : > { %p666_p13 = por %p665_p12, %p664_p11 }
 0x477   : > { %p667_p0 = pnand %p666_p13, %p660_p8 }
 0x479   : > { %670 = shalt.err (!%p667_p0)
}
 0x47a   : > { %s711_s25 = smov 128   ;;  %s712_s26 = smov 8  }
 0x47b   : > { %583 = dma.vmem_to_hbm [thread:$0]  (%p771_p5), %s814_s28, 256, %s819_s5, %s821_s6, %s711_s25, %s711_s25, %s712_s26  }
 0x47c PF: > { %p589_p1 = scmp.ge.s32.totalorder %s705_s15, 2  ;;  %s485_s27 = sand.u32 1, %s693_s12  }
 0x47d   : > { %s486_s29 = scalar_lea.sflag [#allocation3], %s485_s27 }
 0x47e   : > { %p586_p2 = pnand %p589_p1, %p775_p6 }
 0x480   : > { %688 = dma.done.wait (!%p586_p2), %s486_s29, 256  }
 0x481   : > { %690 = vsyncadd (!%p586_p2), %s486_s29, 4294967040  ;;  %p13_p3 = scmp.ge.s32.totalorder %s758_s18, 4   ;;  %s868_s12 = smov %s697_s13 }
 0x482   : > { %s869_s13 = smov %s701_s14  ;;  %s870_s14 = smov %s769_s21 }
 0x483   : > { %s871_s15 = smov %s758_s18  ;;  %15 = sbr.rel (!%p13_p3) target bundleno = 3 (0x3), region = 67 }
 0x48a   :  { %491 = vsyncpa [#allocation3], 1 }
 0x48b   :  { %493 = vsyncpa [#allocation3 + $0x1], 1 }

</bundles_post_ra>
